<compile_context>
chip_gen: v7x
topology: tpu7x:2x2x1
jax: 0.10.0
libtpu: 0.0.40
codegen_flags: <defaults>
</compile_context>

<pallas_src>
import jax
import jax.numpy as jnp
from jax.experimental import pallas as pl
from jax.experimental.pallas import tpu as pltpu


# ----------------------------- Pallas kernel -------------------------------

def _softplus_kernel(x_ref, o_ref):
    # Numerically stable softplus: max(x, 0) + log1p(exp(-|x|)).
    x = x_ref[...].astype(jnp.float32)
    y = jnp.maximum(x, 0.0) + jnp.log1p(jnp.exp(-jnp.abs(x)))
    o_ref[...] = y.astype(o_ref.dtype)


# ------------------------------ wrapper -------------------------------------

_MAX_COLS = 1024                         # lane-dense slab width (multiple of 128)
_TARGET_BLOCK_BYTES = 2 * 1024 * 1024    # ~2 MiB per pipeline block


def _choose_tile_rows(rows, bytes_per_row):
    """Largest multiple-of-8 divisor of `rows` giving ~2 MiB blocks and, when
    possible, >= 2 grid programs (v7x has 2 TensorCores per chip)."""
    tile = max(8, min(rows, _TARGET_BLOCK_BYTES // max(bytes_per_row, 1)))
    if rows >= 16:
        tile = min(tile, rows // 2)          # ensure >= 2 programs for megacore
    tile = max(8, (tile // 8) * 8)
    while rows % tile:                       # must evenly divide the slab
        tile -= 8
    return tile


def _slab_layout(n):
    """Pick (cols, padded_n). Prefer a zero-pad layout when n divides cleanly."""
    for cols in (1024, 512, 256, 128):
        if n % (8 * cols) == 0:
            return cols, n                   # zero-copy fast path
    slab = 8 * _MAX_COLS
    return _MAX_COLS, ((n + slab - 1) // slab) * slab


def softplus_forward(unconstrained):
    """Apply the Softplus transform to the unconstrained parameter on-TPU."""
    orig_shape = unconstrained.shape
    dtype = unconstrained.dtype
    itemsize = jnp.dtype(dtype).itemsize

    # ---- layout plumbing (free for elementwise math): flatten (+pad only if
    # misaligned) so the slab is (rows, cols), rows % 8 == 0, cols % 128 == 0.
    n = int(unconstrained.size)
    cols, padded = _slab_layout(n)

    flat = unconstrained.reshape(-1)
    if padded != n:
        flat = jnp.pad(flat, (0, padded - n))
    rows = padded // cols
    x2d = flat.reshape(rows, cols)

    tile_rows = _choose_tile_rows(rows, cols * itemsize)
    grid = (rows // tile_rows,)

    nbytes = padded * itemsize
    out2d = pl.pallas_call(
        _softplus_kernel,
        out_shape=jax.ShapeDtypeStruct((rows, cols), dtype),
        grid_spec=pl.GridSpec(
            grid=grid,
            in_specs=[pl.BlockSpec((tile_rows, cols), lambda i: (i, 0))],
            out_specs=pl.BlockSpec((tile_rows, cols), lambda i: (i, 0)),
        ),
        compiler_params=pltpu.CompilerParams(
            dimension_semantics=("parallel",),
        ),
        cost_estimate=pl.CostEstimate(
            flops=5 * padded,
            transcendentals=2 * padded,       # exp + log1p per element
            bytes_accessed=2 * nbytes,        # read + write
        ),
    )(x2d)

    if padded != n:
        return out2d.reshape(-1)[:n].reshape(orig_shape)
    return out2d.reshape(orig_shape)


# ------------------------- TransformedParameter ----------------------------

class TransformedParameter:
    """JAX/Pallas analogue of rs_distributions.modules.TransformedParameter
    with a Softplus transform (positivity constraint)."""

    # TODO(synk): the PyTorch module accepts any torch.distributions.Transform;
    # here the transform is fixed to Softplus (forward in Pallas, inverse in JAX).

    def __init__(self, value):
        value = jnp.asarray(value, dtype=jnp.float32)
        # transform.inv(value): softplus^{-1}(y) = y + log(-expm1(-y))
        # (glue: parameter setup is plain JAX, matching the PyTorch __init__)
        self._value = value + jnp.log(-jnp.expm1(-value))

    def __call__(self):
        # forward(): transform(self._value) — elementwise softplus in Pallas.
        return softplus_forward(self._value)


# --------------------------------- main -------------------------------------

if __name__ == "__main__":
    key = jax.random.PRNGKey(0)

    # Primary example: small, strictly positive parameter tensor so the
    # softplus inverse is well-defined. (16*128 = 2048 -> zero-pad fast path.)
    init_value = jax.random.uniform(
        key, (16, 128), dtype=jnp.float32, minval=0.1, maxval=3.0
    )
    module = TransformedParameter(init_value)
    out = jax.block_until_ready(module())

    ref = jax.nn.softplus(module._value)
    assert out.shape == init_value.shape and out.dtype == init_value.dtype
    assert jnp.allclose(out, ref, atol=1e-5, rtol=1e-5)
    assert jnp.allclose(out, init_value, atol=1e-4, rtol=1e-4)

    # Secondary check: non-tile-aligned shape exercising padding + a multi-
    # program ("parallel") grid so both v7x TensorCores would be used.
    key2 = jax.random.PRNGKey(1)
    x2 = jax.random.normal(key2, (256, 257), dtype=jnp.float32)
    y2 = jax.block_until_ready(softplus_forward(x2))
    assert y2.shape == x2.shape
    assert jnp.allclose(y2, jax.nn.softplus(x2), atol=1e-5, rtol=1e-5)

    print("KERNEL_OK")
</pallas_src>

<mosaic_0001>
module attributes {stable_mosaic.version = 11 : i64} {
  func.func @_softplus_kernel(%arg0: i32, %arg1: memref<8x256xf32, #tpu.memory_space<vmem>>, %arg2: memref<8x256xf32, #tpu.memory_space<vmem>>) attributes {dimension_semantics = [#tpu.dimension_semantics<parallel>], iteration_bounds = array<i64: 1>, scalar_prefetch = 0 : i64, scratch_operands = 0 : i64, tpu.core_type = #tpu.core_type<tc>, window_params = [{transform_indices = @transform_0, window_bounds = array<i64: 8, 256>}, {transform_indices = @transform_1, window_bounds = array<i64: 8, 256>}]} {
    %c0 = arith.constant 0 : index
    %c0_0 = arith.constant 0 : index
    %0 = vector.load %arg1[%c0, %c0_0] : memref<8x256xf32, #tpu.memory_space<vmem>>, vector<8x256xf32>
    %cst = arith.constant 0.000000e+00 : f32
    %1 = vector.broadcast %cst : f32 to vector<8x256xf32>
    %2 = arith.maximumf %0, %1 : vector<8x256xf32>
    %3 = math.absf %0 : vector<8x256xf32>
    %cst_1 = arith.constant 0.000000e+00 : f32
    %4 = vector.broadcast %cst_1 : f32 to vector<8x256xf32>
    %5 = arith.subf %4, %3 : vector<8x256xf32>
    %6 = math.exp %5 : vector<8x256xf32>
    %7 = math.log1p %6 : vector<8x256xf32>
    %8 = arith.addf %2, %7 : vector<8x256xf32>
    %c0_2 = arith.constant 0 : index
    %c0_3 = arith.constant 0 : index
    %9 = vector.load %arg2[%c0_2, %c0_3] : memref<8x256xf32, #tpu.memory_space<vmem>>, vector<8x256xf32>
    tpu.vector_store %arg2[%c0_2, %c0_3], %8 {strides = array<i32>} : memref<8x256xf32, #tpu.memory_space<vmem>>, vector<8x256xf32>,
    return
  }
  func.func @transform_0(%arg0: i32) -> (i32, i32) {
    %c0_i32 = arith.constant 0 : i32
    %c0_i32_0 = arith.constant 0 : i32
    return %arg0, %c0_i32 : i32, i32
  }
  func.func @transform_1(%arg0: i32) -> (i32, i32) {
    %c0_i32 = arith.constant 0 : i32
    %c0_i32_0 = arith.constant 0 : i32
    return %arg0, %c0_i32 : i32, i32
  }
}

</mosaic_0001>

<bundles_post_ra>
// kernel: tpu_custom_call.1
= control target key start
LH: loop header
LB: loop body
LE: loop exit
PB: predicated region body
PF: predicated region fallthrough
CT: control target
= control target key end

     0   :  { %6 = vsyncpa [#allocation3], 0  ;;  %s164_s0 = inlined_call_operand.hbm [shape: f32[8,256], index: 0, kind: input, shape index: {}]   ;;  %s165_s1 = inlined_call_operand.hbm [shape: f32[8,256], index: 1, kind: output, shape index: {}]  }
   0x1   :  { %7 = vsyncpa [#allocation4], 0  ;;  %s128_s6 = smov [#allocation2]   ;;  %s80_s10 = scalar_lea.hbm %s164_s0, 256 }
   0x2   :  { %s14_s7 = sshll.u32 %s128_s6, 4  ;;  %p81_p0 = scmp.ne.s32.totalorder %s164_s0, %s80_s10  ;;  %s15_s7 = int_to_ptr.vmem [resolvable:$true] %s14_s7 }
   0x3   :  { %p84_p1 = scmp.lt.u32.totalorder %s80_s10, %s164_s0 }
   0x5   :  { %p86_p2 = pnand %p84_p1, %p81_p0 }
   0x7   :  { %89 = shalt.err (!%p86_p2)
}
   0x8   :  { %s90_s15 = scalar_lea.vmem %s15_s7, 256  ;;  %p95_p4 = scmp.lt.s32.totalorder %s15_s7, %s15_s7 }
   0x9   :  { %p91_p3 = scmp.ne.s32.totalorder %s15_s7, %s90_s15  ;;  %p96_p5 = scmp.lt.s32.totalorder %s90_s15, %s90_s15 }
   0xb   :  { %p97_p6 = por %p96_p5, %p95_p4 }
   0xd   :  { %p98_p7 = pnand %p97_p6, %p91_p3 }
   0xf   :  { %101 = shalt.err (!%p98_p7)
}
  0x10   :  { %17 = dma.hbm_to_vmem [thread:$0]  %s164_s0, 256, %s15_s7, [#allocation3]  }
  0x11   :  { %124 = dma.done.wait [#allocation3], 256  }
  0x12   :  { %125 = vsyncadd [#allocation3], 4294967040  ;;  %v21_v0 = vld [vmem:[#allocation2] sm:$0xff]  ;;  %v22_v1 = vld [vmem:[#allocation2 + $0x8] sm:$0xff]  ;;  %s129_s0 = smov [#allocation5]  }
  0x13   :  { %v25_v2 = vand.u32 2147483647, %v21_v0  ;;  %v26_v3 = vand.u32 2147483647, %v22_v1  ;;  %v23_v20 = vmax.f32 %v21_v0, 0.0  ;;  %v24_v24 = vmax.f32 %v22_v1, 0.0 }
  0x14   :  { %s61_s18 = sshll.u32 %s129_s0, 4  ;;  %s62_s18 = int_to_ptr.vmem [resolvable:$true] %s61_s18 }
  0x15   :  { %v27_v4 = vsub.f32 0.0, %v25_v2  ;;  %v28_v5 = vsub.f32 0.0, %v26_v3  ;;  %s102_s19 = scalar_lea.vmem %s62_s18, 256  ;;  %p107_p9 = scmp.lt.s32.totalorder %s62_s18, %s62_s18 }
  0x16   :  { %p103_p8 = scmp.ne.s32.totalorder %s62_s18, %s102_s19  ;;  %p108_p10 = scmp.lt.s32.totalorder %s102_s19, %s102_s19 }
  0x17   :  { %v29_v6 = vmul.f32 1.442695, %v27_v4  ;;  %v31_v7 = vmul.f32 1.442695, %v28_v5 }
  0x18   :  { %p109_p11 = por %p108_p10, %p107_p9 }
  0x19   :  { %72 = vpow2.f32 %v29_v6 }
  0x1a   :  { %74 = vpow2.f32 %v31_v7  ;;  %p110_p12 = pnand %p109_p11, %p103_p8 }
  0x23   :  { %v73_v8 = vpop.eup %72 }
  0x24   :  { %v75_v9 = vpop.eup %74  ;;  %v33_v10 = vadd.f32 1.0, %v73_v8  ;;  %v36_v12 = vmul.f32 -0.5, %v73_v8  ;;  %v39_v15 = vand.u32 2147483647, %v73_v8 }
  0x25   :  { %v42_v11 = vadd.f32 1.0, %v75_v9  ;;  %v45_v13 = vmul.f32 -0.5, %v75_v9  ;;  %v48_v17 = vand.u32 2147483647, %v75_v9 }
  0x26   :  { %76 = vlog2.f32 %v33_v10  ;;  %v37_v14 = vadd.f32 1.0, %v36_v12  ;;  %vm40_vm0 = vcmp.lt.f32.partialorder %v39_v15, 0.0004427343 }
  0x27   :  { %78 = vlog2.f32 %v42_v11  ;;  %v46_v16 = vadd.f32 1.0, %v45_v13  ;;  %vm49_vm1 = vcmp.lt.f32.partialorder %v48_v17, 0.0004427343 }
  0x28   :  { %v38_v18 = vmul.f32 %v73_v8, %v37_v14 }
  0x29   :  { %v47_v21 = vmul.f32 %v75_v9, %v46_v16 }
  0x30   :  { %v77_v19 = vpop.eup %76 }
  0x31   :  { %v79_v22 = vpop.eup %78  ;;  %v35_v23 = vmul.f32 0.6931472, %v77_v19 }
  0x32   :  { %v44_v25 = vmul.f32 0.6931472, %v79_v22 }
  0x33   :  { %v41_v26 = vsel %vm40_vm0, %v38_v18, %v35_v23 }
  0x34   :  { %v51_v27 = vadd.f32 %v41_v26, %v23_v20  ;;  %v50_v28 = vsel %vm49_vm1, %v47_v21, %v44_v25 }
  0x35   :  { %v52_v29 = vadd.f32 %v50_v28, %v24_v24 }
  0x36   :  { %53 = vst [vmem:[#allocation5] sm:$0xff] %v51_v27 }
  0x37   :  { %54 = vst [vmem:[#allocation5 + $0x8] sm:$0xff] %v52_v29 }
  0x38   :  { %113 = shalt.err (!%p110_p12)
}
  0x39   :  { %s114_s22 = scalar_lea.hbm %s165_s1, 256 }
  0x3a   :  { %p115_p13 = scmp.ne.s32.totalorder %s165_s1, %s114_s22  ;;  %p118_p0 = scmp.lt.u32.totalorder %s114_s22, %s165_s1 }
  0x3c   :  { %p120_p1 = pnand %p118_p0, %p115_p13 }
  0x3e   :  { %123 = shalt.err (!%p120_p1)
}
  0x3f   :  { %64 = dma.vmem_to_hbm [thread:$0]  %s62_s18, 256, %s165_s1, [#allocation4]  }
  0x40   :  { %126 = dma.done.wait [#allocation4], 256  }
  0x41   :  { %127 = vsyncadd [#allocation4], 4294967040 }
  0x42   :  { %68 = vsyncpa [#allocation3], 1 }
  0x43   :  { %69 = vsyncpa [#allocation4], 1 }

</bundles_post_ra>
